<compile_context>
chip_gen: v7x
topology: tpu7x:2x2x1
jax: 0.10.0
libtpu: 0.0.40
codegen_flags: <defaults>
</compile_context>

<pallas_src>
import functools

import jax
import jax.numpy as jnp
from jax.experimental import pallas as pl
from jax.experimental.pallas import tpu as pltpu


# ----------------------------------------------------------------------------
# Pallas kernels
# ----------------------------------------------------------------------------
def _conv_gemm_kernel(*refs, act, n_cols):
    """Fused conv (+ optional 2x2 max-pool) + bias + activation.

    refs = (cols_0, ..., cols_{n_cols-1}, w, b, out)
      cols_i : (K, tm)   bf16   im2col patches for pool offset i
      w      : (Cout, K) bf16   pre-flattened weights
      b      : (Cout, 1) f32
      out    : (Cout, tm) f32   lane-dense (spatial on lanes)
    Pooling: max_i(W @ cols_i) + b, then activation (ReLU commutes with max).
    """
    cols_refs = refs[:n_cols]
    w_ref, b_ref, o_ref = refs[n_cols:]
    w = w_ref[...]
    y = jnp.dot(w, cols_refs[0][...], preferred_element_type=jnp.float32)
    for c_ref in cols_refs[1:]:
        y = jnp.maximum(y, jnp.dot(w, c_ref[...],
                                   preferred_element_type=jnp.float32))
    y = y + b_ref[...]
    if act == "relu":
        y = jnp.maximum(y, 0.0)
    o_ref[...] = y


def _conv_vpu_kernel(cols_ref, w_ref, b_ref, o_ref, *, act):
    """Cout == 1 conv as a VPU broadcast-multiply + sublane reduction.

    cols : (K, tm) f32, w : (K, 1) f32, b : (1, 1) f32, out : (1, tm) f32.
    Avoids driving the MXU with a 1-wide operand; spatial stays on lanes.
    """
    y = jnp.sum(cols_ref[...] * w_ref[...], axis=0, keepdims=True) + b_ref[...]
    if act == "relu":
        y = jnp.maximum(y, 0.0)
    elif act == "sigmoid":
        # exp and the approximate reciprocal both ride the EUP slot.
        y = pl.reciprocal(1.0 + jnp.exp(-y), approx=True)
    o_ref[...] = y


def _latent_kernel(cols_ref, w_ref, b_ref, epspad_ref, fold_ref,
                   musig_ref, z_ref):
    """mu & sigma convs as ONE matmul + fused reparameterization.

    w     : (2*cd, K)  bf16  -- mu weights stacked over sigma weights
    eps   : (2*cd, M)  f32   -- rows [ones ; eps]
    fold  : (cd, 2*cd) f32   -- [I | I], folds mu + eps*sigma without slicing
    Outputs: musig (2*cd, M) = [mu ; sigma],  z (cd, M) = mu + eps*sigma.
    """
    y = jnp.dot(w_ref[...], cols_ref[...],
                preferred_element_type=jnp.float32) + b_ref[...]
    musig_ref[...] = y
    t = y * epspad_ref[...]                      # rows: [mu ; eps*sigma]
    z_ref[...] = jnp.dot(fold_ref[...], t, preferred_element_type=jnp.float32)


# ----------------------------------------------------------------------------
# Layout / glue helpers (pure index plumbing; fuses under jit)
# ----------------------------------------------------------------------------
def _round_up(x, m):
    return ((x + m - 1) // m) * m


def _pad_lanes(a, m_pad):
    m = a.shape[-1]
    return a if m == m_pad else jnp.pad(a, ((0, 0), (0, m_pad - m)))


def _tile_m(m_pad):
    """Lane-tile size: single block while small, 128-multiple blocks at scale."""
    if m_pad < 512:
        return m_pad
    for tm in (512, 256, 128):
        if m_pad % tm == 0:
            return tm
    return m_pad


def _im2colT(x, k, pad):
    """x: (C, N, H, W) -> colsT (k*k*C, N*Ho*Wo), row order (dh, dw, c)."""
    c, n, h, w = x.shape
    xp = jnp.pad(x, ((0, 0), (0, 0), (pad, pad), (pad, pad))) if pad > 0 else x
    ho, wo = h + 2 * pad - k + 1, w + 2 * pad - k + 1
    rows = [xp[:, :, dh:dh + ho, dw:dw + wo]
            for dh in range(k) for dw in range(k)]
    return jnp.stack(rows, axis=0).reshape(k * k * c, n * ho * wo), (n, ho, wo)


def _im2colT_pooled(x, k, pad):
    """Patches for conv followed by MaxPool2d(2): one colsT per pool offset."""
    c, n, h, w = x.shape
    xp = jnp.pad(x, ((0, 0), (0, 0), (pad, pad), (pad, pad))) if pad > 0 else x
    ho, wo = h + 2 * pad - k + 1, w + 2 * pad - k + 1
    hp, wp = ho // 2, wo // 2
    cols4 = []
    for ph in range(2):
        for pw in range(2):
            rows = [xp[:, :,
                       ph + dh: ph + dh + 2 * hp: 2,
                       pw + dw: pw + dw + 2 * wp: 2]
                    for dh in range(k) for dw in range(k)]
            cols4.append(jnp.stack(rows, axis=0).reshape(k * k * c, n * hp * wp))
    return cols4, (n, hp, wp)


def upsample2_nearest(x):
    """nearest x2 on (C, N, H, W); fuses into the next conv's im2col producer."""
    return jnp.repeat(jnp.repeat(x, 2, axis=2), 2, axis=3)


# ----------------------------------------------------------------------------
# pallas_call wrappers
# ----------------------------------------------------------------------------
def _gemm_call(cols_list, w_bf, b_col, act):
    k_dim, m_pad = cols_list[0].shape
    c_out = w_bf.shape[0]
    tm = _tile_m(m_pad)
    in_specs = ([pl.BlockSpec((k_dim, tm), lambda i: (0, i)) for _ in cols_list]
                + [pl.BlockSpec((c_out, k_dim), lambda i: (0, 0)),
                   pl.BlockSpec((c_out, 1), lambda i: (0, 0))])
    return pl.pallas_call(
        functools.partial(_conv_gemm_kernel, act=act, n_cols=len(cols_list)),
        out_shape=jax.ShapeDtypeStruct((c_out, m_pad), jnp.float32),
        grid=(m_pad // tm,),
        in_specs=in_specs,
        out_specs=pl.BlockSpec((c_out, tm), lambda i: (0, i)),
        compiler_params=pltpu.CompilerParams(
            dimension_semantics=("parallel",)),
    )(*cols_list, w_bf, b_col)


def conv_relu_pool(x, w_bf, b_col, k, pad):
    """Conv2d + ReLU + MaxPool2d(2) fused into one Pallas kernel."""
    cols4, (n, hp, wp) = _im2colT_pooled(x, k, pad)
    m = n * hp * wp
    m_pad = _round_up(m, 128)
    cols4 = [_pad_lanes(c, m_pad).astype(jnp.bfloat16) for c in cols4]
    out = _gemm_call(cols4, w_bf, b_col, act="relu")
    return out[:, :m].reshape(w_bf.shape[0], n, hp, wp)


def conv_act(x, w_bf, b_col, k, pad, act):
    """Conv2d (stride 1) + bias + activation; lane-dense output."""
    cols, (n, ho, wo) = _im2colT(x, k, pad)
    m = n * ho * wo
    m_pad = _round_up(m, 128)
    cols = _pad_lanes(cols, m_pad).astype(jnp.bfloat16)
    out = _gemm_call([cols], w_bf, b_col, act=act)
    return out[:, :m].reshape(w_bf.shape[0], n, ho, wo)


def conv_cout1(x, w_col, b_col, k, pad, act):
    """Conv2d with a single output channel on the VPU (no 1-wide MXU op)."""
    cols, (n, ho, wo) = _im2colT(x, k, pad)
    m = n * ho * wo
    m_pad = _round_up(m, 128)
    cols = _pad_lanes(cols, m_pad)           # stays f32 (v5e-safe elementwise)
    k_dim = cols.shape[0]
    tm = _tile_m(m_pad)
    out = pl.pallas_call(
        functools.partial(_conv_vpu_kernel, act=act),
        out_shape=jax.ShapeDtypeStruct((1, m_pad), jnp.float32),
        grid=(m_pad // tm,),
        in_specs=[pl.BlockSpec((k_dim, tm), lambda i: (0, i)),
                  pl.BlockSpec((k_dim, 1), lambda i: (0, 0)),
                  pl.BlockSpec((1, 1), lambda i: (0, 0))],
        out_specs=pl.BlockSpec((1, tm), lambda i: (0, i)),
        compiler_params=pltpu.CompilerParams(
            dimension_semantics=("parallel",)),
    )(cols, w_col, b_col)
    return out[:, :m].reshape(1, n, ho, wo)


def encode_latent_and_sample(h, w_cat_bf, b_cat, fold, eps_key):
    """mu/sigma convs (one concatenated matmul) + z = mu + eps*sigma, 1 launch."""
    cd = fold.shape[0]
    cols, (n, ho, wo) = _im2colT(h, 4, 0)
    m = n * ho * wo
    m_pad = _round_up(m, 128)
    cols = _pad_lanes(cols, m_pad).astype(jnp.bfloat16)
    eps = jax.random.normal(eps_key, (cd, m), jnp.float32)
    eps_pad = _pad_lanes(
        jnp.concatenate([jnp.ones((cd, m), jnp.float32), eps], axis=0), m_pad)
    musig, z = pl.pallas_call(
        _latent_kernel,
        out_shape=(jax.ShapeDtypeStruct((2 * cd, m_pad), jnp.float32),
                   jax.ShapeDtypeStruct((cd, m_pad), jnp.float32)),
    )(cols, w_cat_bf, b_cat, eps_pad, fold)
    mu = musig[:cd, :m].reshape(cd, n, ho, wo)
    sigma = musig[cd:, :m].reshape(cd, n, ho, wo)
    z = z[:, :m].reshape(cd, n, ho, wo)
    return mu, sigma, z


# ----------------------------------------------------------------------------
# Parameter init (PyTorch-style uniform) + one-time weight preparation
# ----------------------------------------------------------------------------
def _flatten_conv_w(w):
    """(Cout, Cin, kh, kw) -> (Cout, kh*kw*Cin), matching colsT row order."""
    c_out, c_in, kh, kw = w.shape
    return jnp.transpose(w, (0, 2, 3, 1)).reshape(c_out, kh * kw * c_in)


def _convT_as_conv_w(w_t):
    """ConvTranspose2d weight (Cin, Cout, k, k) -> equivalent conv weight."""
    return jnp.transpose(w_t[:, :, ::-1, ::-1], (1, 0, 2, 3))


def _init_conv_pt(key, c_out, c_in, k):
    kw_, kb_ = jax.random.split(key)
    bound = 1.0 / (c_in * k * k) ** 0.5
    w = jax.random.uniform(kw_, (c_out, c_in, k, k), jnp.float32, -bound, bound)
    b = jax.random.uniform(kb_, (c_out,), jnp.float32, -bound, bound)
    return w, b


def _init_convT_pt(key, c_in, c_out, k):
    kw_, kb_ = jax.random.split(key)
    bound = 1.0 / (c_out * k * k) ** 0.5
    w = jax.random.uniform(kw_, (c_in, c_out, k, k), jnp.float32, -bound, bound)
    b = jax.random.uniform(kb_, (c_out,), jnp.float32, -bound, bound)
    return w, b


def init_params(key, hidden_dims, compressed_dim):
    h0, h1 = hidden_dims
    cd = compressed_dim
    keys = jax.random.split(key, 8)
    e0_w, e0_b = _init_conv_pt(keys[0], h0, 1, 3)
    e1_w, e1_b = _init_conv_pt(keys[1], h1, h0, 3)
    emu_w, emu_b = _init_conv_pt(keys[2], cd, h1, 4)
    esg_w, esg_b = _init_conv_pt(keys[3], cd, h1, 4)
    dL_w, dL_b = _init_convT_pt(keys[4], cd, h1, 2)
    d1_w, d1_b = _init_convT_pt(keys[5], h1, h0, 2)
    o1_w, o1_b = _init_conv_pt(keys[6], 1, h0, 3)
    o2_w, o2_b = _init_conv_pt(keys[7], 1, 1, 3)

    bf = jnp.bfloat16
    return {
        # encoder (pre-flattened (Cout, k*k*Cin), bf16 for the MXU path)
        "e0_w": _flatten_conv_w(e0_w).astype(bf), "e0_b": e0_b.reshape(-1, 1),
        "e1_w": _flatten_conv_w(e1_w).astype(bf), "e1_b": e1_b.reshape(-1, 1),
        # mu / sigma convs concatenated along Cout -> a single matmul
        "elat_w": jnp.concatenate([_flatten_conv_w(emu_w),
                                   _flatten_conv_w(esg_w)], axis=0).astype(bf),
        "elat_b": jnp.concatenate([emu_b, esg_b]).reshape(-1, 1),
        "fold": jnp.concatenate([jnp.eye(cd, dtype=jnp.float32)] * 2, axis=1),
        # decoder (ConvTranspose stride-1 == conv with flipped/swapped weights)
        "dL_w": _flatten_conv_w(_convT_as_conv_w(dL_w)).astype(bf),
        "dL_b": dL_b.reshape(-1, 1),
        "d1_w": _flatten_conv_w(_convT_as_conv_w(d1_w)).astype(bf),
        "d1_b": d1_b.reshape(-1, 1),
        # Cout == 1 convs stay f32, stored as (K, 1) columns for the VPU path
        "do1_w": _flatten_conv_w(o1_w).T, "do1_b": o1_b.reshape(-1, 1),
        "do2_w": _flatten_conv_w(o2_w).T, "do2_b": o2_b.reshape(-1, 1),
    }


# ----------------------------------------------------------------------------
# Full forward pass (matches Convolutional_VAE.forward)
# ----------------------------------------------------------------------------
def conv_vae_forward(x_nchw, params, eps_key):
    x = jnp.transpose(x_nchw, (1, 0, 2, 3))          # NCHW -> (C, N, H, W)

    # ---- encoder: Conv + ReLU + MaxPool fused, one kernel per layer ----
    h = conv_relu_pool(x, params["e0_w"], params["e0_b"], k=3, pad=3)
    h = conv_relu_pool(h, params["e1_w"], params["e1_b"], k=3, pad=3)

    # ---- mu / sigma / reparameterization (z = mu + eps*sigma): one kernel ----
    mu, sigma, z = encode_latent_and_sample(
        h, params["elat_w"], params["elat_b"], params["fold"], eps_key)

    # ---- decoder ----
    # ConvTranspose(cd->h1, k=2)        == conv, pad = 1
    # ConvTranspose(h1->h0, k=2, pad=1) == conv, pad = 0
    d = conv_act(z, params["dL_w"], params["dL_b"], k=2, pad=1, act="relu")
    d = conv_act(d, params["d1_w"], params["d1_b"], k=2, pad=0, act="relu")
    d = upsample2_nearest(d)
    d = conv_cout1(d, params["do1_w"], params["do1_b"], k=3, pad=1, act="none")
    d = upsample2_nearest(d)
    d = conv_cout1(d, params["do2_w"], params["do2_b"], k=3, pad=1, act="sigmoid")

    # back to NCHW
    x_hat = jnp.transpose(d, (1, 0, 2, 3))
    mu_out = jnp.transpose(mu, (1, 0, 2, 3))
    sigma_out = jnp.transpose(sigma, (1, 0, 2, 3))
    return x_hat, mu_out, sigma_out


# ----------------------------------------------------------------------------
if __name__ == "__main__":
    key = jax.random.PRNGKey(0)
    k_param, k_x, k_eps = jax.random.split(key, 3)

    batch = 2
    hidden_dims = [8, 16]
    compressed_dim = 4
    H = W = 16  # input images: (batch, 1, 16, 16) NCHW

    params = init_params(k_param, hidden_dims, compressed_dim)
    x = jax.random.normal(k_x, (batch, 1, H, W), jnp.float32)

    fwd = jax.jit(conv_vae_forward)
    x_hat, mu, sigma = fwd(x, params, k_eps)
    jax.block_until_ready((x_hat, mu, sigma))

    assert x_hat.shape == (batch, 1, 16, 16), x_hat.shape
    assert mu.shape == (batch, compressed_dim, 4, 4), mu.shape
    assert sigma.shape == (batch, compressed_dim, 4, 4), sigma.shape
    assert bool(jnp.all(jnp.isfinite(x_hat)))
    assert bool(jnp.all((x_hat >= 0.0) & (x_hat <= 1.0)))  # sigmoid output

    print("KERNEL_OK")
</pallas_src>

<mosaic_0001>
module attributes {stable_mosaic.version = 11 : i64} {
  func.func @_conv_gemm_kernel(%arg0: i32, %arg1: memref<9x256xbf16, #tpu.memory_space<vmem>>, %arg2: memref<9x256xbf16, #tpu.memory_space<vmem>>, %arg3: memref<9x256xbf16, #tpu.memory_space<vmem>>, %arg4: memref<9x256xbf16, #tpu.memory_space<vmem>>, %arg5: memref<8x9xbf16, #tpu.memory_space<vmem>>, %arg6: memref<8x1xf32, #tpu.memory_space<vmem>>, %arg7: memref<8x256xf32, #tpu.memory_space<vmem>>) attributes {dimension_semantics = [#tpu.dimension_semantics<parallel>], iteration_bounds = array<i64: 1>, scalar_prefetch = 0 : i64, scratch_operands = 0 : i64, tpu.core_type = #tpu.core_type<tc>, window_params = [{transform_indices = @transform_0, window_bounds = array<i64: 9, 256>}, {transform_indices = @transform_1, window_bounds = array<i64: 9, 256>}, {transform_indices = @transform_2, window_bounds = array<i64: 9, 256>}, {transform_indices = @transform_3, window_bounds = array<i64: 9, 256>}, {pipeline_mode = #tpu.pipeline_mode<synchronous>, transform_indices = @transform_4, window_bounds = array<i64: 8, 9>}, {pipeline_mode = #tpu.pipeline_mode<synchronous>, transform_indices = @transform_5, window_bounds = array<i64: 8, 1>}, {transform_indices = @transform_6, window_bounds = array<i64: 8, 256>}]} {
    %c0 = arith.constant 0 : index
    %c0_0 = arith.constant 0 : index
    %0 = vector.load %arg5[%c0, %c0_0] : memref<8x9xbf16, #tpu.memory_space<vmem>>, vector<8x9xbf16>
    %c0_1 = arith.constant 0 : index
    %c0_2 = arith.constant 0 : index
    %1 = vector.load %arg1[%c0_1, %c0_2] : memref<9x256xbf16, #tpu.memory_space<vmem>>, vector<9x256xbf16>
    %cst = arith.constant dense<0.000000e+00> : vector<8x256xf32>
    %2 = tpu.matmul %0, %1, %cst {dimension_numbers = #tpu.dot_dimension_numbers<[1], [0], [0], [1], [0, 0, 1, 1], [], []>} : vector<8x9xbf16>, vector<9x256xbf16>, vector<8x256xf32> -> vector<8x256xf32>
    %c0_3 = arith.constant 0 : index
    %c0_4 = arith.constant 0 : index
    %3 = vector.load %arg2[%c0_3, %c0_4] : memref<9x256xbf16, #tpu.memory_space<vmem>>, vector<9x256xbf16>
    %cst_5 = arith.constant dense<0.000000e+00> : vector<8x256xf32>
    %4 = tpu.matmul %0, %3, %cst_5 {dimension_numbers = #tpu.dot_dimension_numbers<[1], [0], [0], [1], [0, 0, 1, 1], [], []>} : vector<8x9xbf16>, vector<9x256xbf16>, vector<8x256xf32> -> vector<8x256xf32>
    %5 = arith.maximumf %2, %4 : vector<8x256xf32>
    %c0_6 = arith.constant 0 : index
    %c0_7 = arith.constant 0 : index
    %6 = vector.load %arg3[%c0_6, %c0_7] : memref<9x256xbf16, #tpu.memory_space<vmem>>, vector<9x256xbf16>
    %cst_8 = arith.constant dense<0.000000e+00> : vector<8x256xf32>
    %7 = tpu.matmul %0, %6, %cst_8 {dimension_numbers = #tpu.dot_dimension_numbers<[1], [0], [0], [1], [0, 0, 1, 1], [], []>} : vector<8x9xbf16>, vector<9x256xbf16>, vector<8x256xf32> -> vector<8x256xf32>
    %8 = arith.maximumf %5, %7 : vector<8x256xf32>
    %c0_9 = arith.constant 0 : index
    %c0_10 = arith.constant 0 : index
    %9 = vector.load %arg4[%c0_9, %c0_10] : memref<9x256xbf16, #tpu.memory_space<vmem>>, vector<9x256xbf16>
    %cst_11 = arith.constant dense<0.000000e+00> : vector<8x256xf32>
    %10 = tpu.matmul %0, %9, %cst_11 {dimension_numbers = #tpu.dot_dimension_numbers<[1], [0], [0], [1], [0, 0, 1, 1], [], []>} : vector<8x9xbf16>, vector<9x256xbf16>, vector<8x256xf32> -> vector<8x256xf32>
    %11 = arith.maximumf %8, %10 : vector<8x256xf32>
    %c0_12 = arith.constant 0 : index
    %c0_13 = arith.constant 0 : index
    %12 = vector.load %arg6[%c0_12, %c0_13] : memref<8x1xf32, #tpu.memory_space<vmem>>, vector<8x1xf32>
    %13 = vector.broadcast %12 : vector<8x1xf32> to vector<8x256xf32>
    %14 = arith.addf %11, %13 : vector<8x256xf32>
    %cst_14 = arith.constant 0.000000e+00 : f32
    %15 = vector.broadcast %cst_14 : f32 to vector<8x256xf32>
    %16 = arith.maximumf %14, %15 : vector<8x256xf32>
    %c0_15 = arith.constant 0 : index
    %c0_16 = arith.constant 0 : index
    %17 = vector.load %arg7[%c0_15, %c0_16] : memref<8x256xf32, #tpu.memory_space<vmem>>, vector<8x256xf32>
    tpu.vector_store %arg7[%c0_15, %c0_16], %16 {strides = array<i32>} : memref<8x256xf32, #tpu.memory_space<vmem>>, vector<8x256xf32>,
    return
  }
  func.func @transform_0(%arg0: i32) -> (i32, i32) {
    %c0_i32 = arith.constant 0 : i32
    %c0_i32_0 = arith.constant 0 : i32
    return %c0_i32, %arg0 : i32, i32
  }
  func.func @transform_1(%arg0: i32) -> (i32, i32) {
    %c0_i32 = arith.constant 0 : i32
    %c0_i32_0 = arith.constant 0 : i32
    return %c0_i32, %arg0 : i32, i32
  }
  func.func @transform_2(%arg0: i32) -> (i32, i32) {
    %c0_i32 = arith.constant 0 : i32
    %c0_i32_0 = arith.constant 0 : i32
    return %c0_i32, %arg0 : i32, i32
  }
  func.func @transform_3(%arg0: i32) -> (i32, i32) {
    %c0_i32 = arith.constant 0 : i32
    %c0_i32_0 = arith.constant 0 : i32
    return %c0_i32, %arg0 : i32, i32
  }
  func.func @transform_4(%arg0: i32) -> (i32, i32) {
    %c0_i32 = arith.constant 0 : i32
    %c0_i32_0 = arith.constant 0 : i32
    %c0_i32_1 = arith.constant 0 : i32
    return %c0_i32, %c0_i32_0 : i32, i32
  }
  func.func @transform_5(%arg0: i32) -> (i32, i32) {
    %c0_i32 = arith.constant 0 : i32
    %c0_i32_0 = arith.constant 0 : i32
    %c0_i32_1 = arith.constant 0 : i32
    return %c0_i32, %c0_i32_0 : i32, i32
  }
  func.func @transform_6(%arg0: i32) -> (i32, i32) {
    %c0_i32 = arith.constant 0 : i32
    %c0_i32_0 = arith.constant 0 : i32
    return %c0_i32, %arg0 : i32, i32
  }
}

module attributes {stable_mosaic.version = 11 : i64} {
  func.func @_conv_gemm_kernel(%arg0: i32, %arg1: memref<72x128xbf16, #tpu.memory_space<vmem>>, %arg2: memref<72x128xbf16, #tpu.memory_space<vmem>>, %arg3: memref<72x128xbf16, #tpu.memory_space<vmem>>, %arg4: memref<72x128xbf16, #tpu.memory_space<vmem>>, %arg5: memref<16x72xbf16, #tpu.memory_space<vmem>>, %arg6: memref<16x1xf32, #tpu.memory_space<vmem>>, %arg7: memref<16x128xf32, #tpu.memory_space<vmem>>) attributes {dimension_semantics = [#tpu.dimension_semantics<parallel>], iteration_bounds = array<i64: 1>, scalar_prefetch = 0 : i64, scratch_operands = 0 : i64, tpu.core_type = #tpu.core_type<tc>, window_params = [{transform_indices = @transform_0, window_bounds = array<i64: 72, 128>}, {transform_indices = @transform_1, window_bounds = array<i64: 72, 128>}, {transform_indices = @transform_2, window_bounds = array<i64: 72, 128>}, {transform_indices = @transform_3, window_bounds = array<i64: 72, 128>}, {pipeline_mode = #tpu.pipeline_mode<synchronous>, transform_indices = @transform_4, window_bounds = array<i64: 16, 72>}, {pipeline_mode = #tpu.pipeline_mode<synchronous>, transform_indices = @transform_5, window_bounds = array<i64: 16, 1>}, {transform_indices = @transform_6, window_bounds = array<i64: 16, 128>}]} {
    %c0 = arith.constant 0 : index
    %c0_0 = arith.constant 0 : index
    %0 = vector.load %arg5[%c0, %c0_0] : memref<16x72xbf16, #tpu.memory_space<vmem>>, vector<16x72xbf16>
    %c0_1 = arith.constant 0 : index
    %c0_2 = arith.constant 0 : index
    %1 = vector.load %arg1[%c0_1, %c0_2] : memref<72x128xbf16, #tpu.memory_space<vmem>>, vector<72x128xbf16>
    %cst = arith.constant dense<0.000000e+00> : vector<16x128xf32>
    %2 = tpu.matmul %0, %1, %cst {dimension_numbers = #tpu.dot_dimension_numbers<[1], [0], [0], [1], [0, 0, 1, 1], [], []>} : vector<16x72xbf16>, vector<72x128xbf16>, vector<16x128xf32> -> vector<16x128xf32>
    %c0_3 = arith.constant 0 : index
    %c0_4 = arith.constant 0 : index
    %3 = vector.load %arg2[%c0_3, %c0_4] : memref<72x128xbf16, #tpu.memory_space<vmem>>, vector<72x128xbf16>
    %cst_5 = arith.constant dense<0.000000e+00> : vector<16x128xf32>
    %4 = tpu.matmul %0, %3, %cst_5 {dimension_numbers = #tpu.dot_dimension_numbers<[1], [0], [0], [1], [0, 0, 1, 1], [], []>} : vector<16x72xbf16>, vector<72x128xbf16>, vector<16x128xf32> -> vector<16x128xf32>
    %5 = arith.maximumf %2, %4 : vector<16x128xf32>
    %c0_6 = arith.constant 0 : index
    %c0_7 = arith.constant 0 : index
    %6 = vector.load %arg3[%c0_6, %c0_7] : memref<72x128xbf16, #tpu.memory_space<vmem>>, vector<72x128xbf16>
    %cst_8 = arith.constant dense<0.000000e+00> : vector<16x128xf32>
    %7 = tpu.matmul %0, %6, %cst_8 {dimension_numbers = #tpu.dot_dimension_numbers<[1], [0], [0], [1], [0, 0, 1, 1], [], []>} : vector<16x72xbf16>, vector<72x128xbf16>, vector<16x128xf32> -> vector<16x128xf32>
    %8 = arith.maximumf %5, %7 : vector<16x128xf32>
    %c0_9 = arith.constant 0 : index
    %c0_10 = arith.constant 0 : index
    %9 = vector.load %arg4[%c0_9, %c0_10] : memref<72x128xbf16, #tpu.memory_space<vmem>>, vector<72x128xbf16>
    %cst_11 = arith.constant dense<0.000000e+00> : vector<16x128xf32>
    %10 = tpu.matmul %0, %9, %cst_11 {dimension_numbers = #tpu.dot_dimension_numbers<[1], [0], [0], [1], [0, 0, 1, 1], [], []>} : vector<16x72xbf16>, vector<72x128xbf16>, vector<16x128xf32> -> vector<16x128xf32>
    %11 = arith.maximumf %8, %10 : vector<16x128xf32>
    %c0_12 = arith.constant 0 : index
    %c0_13 = arith.constant 0 : index
    %12 = vector.load %arg6[%c0_12, %c0_13] : memref<16x1xf32, #tpu.memory_space<vmem>>, vector<16x1xf32>
    %13 = vector.broadcast %12 : vector<16x1xf32> to vector<16x128xf32>
    %14 = arith.addf %11, %13 : vector<16x128xf32>
    %cst_14 = arith.constant 0.000000e+00 : f32
    %15 = vector.broadcast %cst_14 : f32 to vector<16x128xf32>
    %16 = arith.maximumf %14, %15 : vector<16x128xf32>
    %c0_15 = arith.constant 0 : index
    %c0_16 = arith.constant 0 : index
    %17 = vector.load %arg7[%c0_15, %c0_16] : memref<16x128xf32, #tpu.memory_space<vmem>>, vector<16x128xf32>
    tpu.vector_store %arg7[%c0_15, %c0_16], %16 {strides = array<i32>} : memref<16x128xf32, #tpu.memory_space<vmem>>, vector<16x128xf32>,
    return
  }
  func.func @transform_0(%arg0: i32) -> (i32, i32) {
    %c0_i32 = arith.constant 0 : i32
    %c0_i32_0 = arith.constant 0 : i32
    return %c0_i32, %arg0 : i32, i32
  }
  func.func @transform_1(%arg0: i32) -> (i32, i32) {
    %c0_i32 = arith.constant 0 : i32
    %c0_i32_0 = arith.constant 0 : i32
    return %c0_i32, %arg0 : i32, i32
  }
  func.func @transform_2(%arg0: i32) -> (i32, i32) {
    %c0_i32 = arith.constant 0 : i32
    %c0_i32_0 = arith.constant 0 : i32
    return %c0_i32, %arg0 : i32, i32
  }
  func.func @transform_3(%arg0: i32) -> (i32, i32) {
    %c0_i32 = arith.constant 0 : i32
    %c0_i32_0 = arith.constant 0 : i32
    return %c0_i32, %arg0 : i32, i32
  }
  func.func @transform_4(%arg0: i32) -> (i32, i32) {
    %c0_i32 = arith.constant 0 : i32
    %c0_i32_0 = arith.constant 0 : i32
    %c0_i32_1 = arith.constant 0 : i32
    return %c0_i32, %c0_i32_0 : i32, i32
  }
  func.func @transform_5(%arg0: i32) -> (i32, i32) {
    %c0_i32 = arith.constant 0 : i32
    %c0_i32_0 = arith.constant 0 : i32
    %c0_i32_1 = arith.constant 0 : i32
    return %c0_i32, %c0_i32_0 : i32, i32
  }
  func.func @transform_6(%arg0: i32) -> (i32, i32) {
    %c0_i32 = arith.constant 0 : i32
    %c0_i32_0 = arith.constant 0 : i32
    return %c0_i32, %arg0 : i32, i32
  }
}

module attributes {stable_mosaic.version = 11 : i64} {
  func.func @_latent_kernel(%arg0: memref<256x128xbf16, #tpu.memory_space<vmem>>, %arg1: memref<8x256xbf16, #tpu.memory_space<vmem>>, %arg2: memref<8x1xf32, #tpu.memory_space<vmem>>, %arg3: memref<8x128xf32, #tpu.memory_space<vmem>>, %arg4: memref<4x8xf32, #tpu.memory_space<vmem>>, %arg5: memref<8x128xf32, #tpu.memory_space<vmem>>, %arg6: memref<4x128xf32, #tpu.memory_space<vmem>>) attributes {dimension_semantics = [], scalar_prefetch = 0 : i64, scratch_operands = 0 : i64, tpu.core_type = #tpu.core_type<tc>} {
    %c0 = arith.constant 0 : index
    %c0_0 = arith.constant 0 : index
    %0 = vector.load %arg1[%c0, %c0_0] : memref<8x256xbf16, #tpu.memory_space<vmem>>, vector<8x256xbf16>
    %c0_1 = arith.constant 0 : index
    %c0_2 = arith.constant 0 : index
    %1 = vector.load %arg0[%c0_1, %c0_2] : memref<256x128xbf16, #tpu.memory_space<vmem>>, vector<256x128xbf16>
    %cst = arith.constant dense<0.000000e+00> : vector<8x128xf32>
    %2 = tpu.matmul %0, %1, %cst {dimension_numbers = #tpu.dot_dimension_numbers<[1], [0], [0], [1], [0, 0, 1, 1], [], []>} : vector<8x256xbf16>, vector<256x128xbf16>, vector<8x128xf32> -> vector<8x128xf32>
    %c0_3 = arith.constant 0 : index
    %c0_4 = arith.constant 0 : index
    %3 = vector.load %arg2[%c0_3, %c0_4] : memref<8x1xf32, #tpu.memory_space<vmem>>, vector<8x1xf32>
    %4 = vector.broadcast %3 : vector<8x1xf32> to vector<8x128xf32>
    %5 = arith.addf %2, %4 : vector<8x128xf32>
    %c0_5 = arith.constant 0 : index
    %c0_6 = arith.constant 0 : index
    %6 = vector.load %arg5[%c0_5, %c0_6] : memref<8x128xf32, #tpu.memory_space<vmem>>, vector<8x128xf32>
    tpu.vector_store %arg5[%c0_5, %c0_6], %5 {strides = array<i32>} : memref<8x128xf32, #tpu.memory_space<vmem>>, vector<8x128xf32>,
    %c0_7 = arith.constant 0 : index
    %c0_8 = arith.constant 0 : index
    %7 = vector.load %arg3[%c0_7, %c0_8] : memref<8x128xf32, #tpu.memory_space<vmem>>, vector<8x128xf32>
    %8 = arith.mulf %5, %7 : vector<8x128xf32>
    %c0_9 = arith.constant 0 : index
    %c0_10 = arith.constant 0 : index
    %9 = vector.load %arg4[%c0_9, %c0_10] : memref<4x8xf32, #tpu.memory_space<vmem>>, vector<4x8xf32>
    %cst_11 = arith.constant dense<0.000000e+00> : vector<4x128xf32>
    %10 = tpu.matmul %9, %8, %cst_11 {dimension_numbers = #tpu.dot_dimension_numbers<[1], [0], [0], [1], [0, 0, 1, 1], [], []>} : vector<4x8xf32>, vector<8x128xf32>, vector<4x128xf32> -> vector<4x128xf32>
    %c0_12 = arith.constant 0 : index
    %c0_13 = arith.constant 0 : index
    %11 = vector.load %arg6[%c0_12, %c0_13] : memref<4x128xf32, #tpu.memory_space<vmem>>, vector<4x128xf32>
    tpu.vector_store %arg6[%c0_12, %c0_13], %10 {strides = array<i32>} : memref<4x128xf32, #tpu.memory_space<vmem>>, vector<4x128xf32>,
    return
  }
}

module attributes {stable_mosaic.version = 11 : i64} {
  func.func @_conv_gemm_kernel(%arg0: i32, %arg1: memref<16x128xbf16, #tpu.memory_space<vmem>>, %arg2: memref<16x16xbf16, #tpu.memory_space<vmem>>, %arg3: memref<16x1xf32, #tpu.memory_space<vmem>>, %arg4: memref<16x128xf32, #tpu.memory_space<vmem>>) attributes {dimension_semantics = [#tpu.dimension_semantics<parallel>], iteration_bounds = array<i64: 1>, scalar_prefetch = 0 : i64, scratch_operands = 0 : i64, tpu.core_type = #tpu.core_type<tc>, window_params = [{transform_indices = @transform_0, window_bounds = array<i64: 16, 128>}, {pipeline_mode = #tpu.pipeline_mode<synchronous>, transform_indices = @transform_1, window_bounds = array<i64: 16, 16>}, {pipeline_mode = #tpu.pipeline_mode<synchronous>, transform_indices = @transform_2, window_bounds = array<i64: 16, 1>}, {transform_indices = @transform_3, window_bounds = array<i64: 16, 128>}]} {
    %c0 = arith.constant 0 : index
    %c0_0 = arith.constant 0 : index
    %0 = vector.load %arg2[%c0, %c0_0] : memref<16x16xbf16, #tpu.memory_space<vmem>>, vector<16x16xbf16>
    %c0_1 = arith.constant 0 : index
    %c0_2 = arith.constant 0 : index
    %1 = vector.load %arg1[%c0_1, %c0_2] : memref<16x128xbf16, #tpu.memory_space<vmem>>, vector<16x128xbf16>
    %cst = arith.constant dense<0.000000e+00> : vector<16x128xf32>
    %2 = tpu.matmul %0, %1, %cst {dimension_numbers = #tpu.dot_dimension_numbers<[1], [0], [0], [1], [0, 0, 1, 1], [], []>} : vector<16x16xbf16>, vector<16x128xbf16>, vector<16x128xf32> -> vector<16x128xf32>
    %c0_3 = arith.constant 0 : index
    %c0_4 = arith.constant 0 : index
    %3 = vector.load %arg3[%c0_3, %c0_4] : memref<16x1xf32, #tpu.memory_space<vmem>>, vector<16x1xf32>
    %4 = vector.broadcast %3 : vector<16x1xf32> to vector<16x128xf32>
    %5 = arith.addf %2, %4 : vector<16x128xf32>
    %cst_5 = arith.constant 0.000000e+00 : f32
    %6 = vector.broadcast %cst_5 : f32 to vector<16x128xf32>
    %7 = arith.maximumf %5, %6 : vector<16x128xf32>
    %c0_6 = arith.constant 0 : index
    %c0_7 = arith.constant 0 : index
    %8 = vector.load %arg4[%c0_6, %c0_7] : memref<16x128xf32, #tpu.memory_space<vmem>>, vector<16x128xf32>
    tpu.vector_store %arg4[%c0_6, %c0_7], %7 {strides = array<i32>} : memref<16x128xf32, #tpu.memory_space<vmem>>, vector<16x128xf32>,
    return
  }
  func.func @transform_0(%arg0: i32) -> (i32, i32) {
    %c0_i32 = arith.constant 0 : i32
    %c0_i32_0 = arith.constant 0 : i32
    return %c0_i32, %arg0 : i32, i32
  }
  func.func @transform_1(%arg0: i32) -> (i32, i32) {
    %c0_i32 = arith.constant 0 : i32
    %c0_i32_0 = arith.constant 0 : i32
    %c0_i32_1 = arith.constant 0 : i32
    return %c0_i32, %c0_i32_0 : i32, i32
  }
  func.func @transform_2(%arg0: i32) -> (i32, i32) {
    %c0_i32 = arith.constant 0 : i32
    %c0_i32_0 = arith.constant 0 : i32
    %c0_i32_1 = arith.constant 0 : i32
    return %c0_i32, %c0_i32_0 : i32, i32
  }
  func.func @transform_3(%arg0: i32) -> (i32, i32) {
    %c0_i32 = arith.constant 0 : i32
    %c0_i32_0 = arith.constant 0 : i32
    return %c0_i32, %arg0 : i32, i32
  }
}

module attributes {stable_mosaic.version = 11 : i64} {
  func.func @_conv_gemm_kernel(%arg0: i32, %arg1: memref<64x128xbf16, #tpu.memory_space<vmem>>, %arg2: memref<8x64xbf16, #tpu.memory_space<vmem>>, %arg3: memref<8x1xf32, #tpu.memory_space<vmem>>, %arg4: memref<8x128xf32, #tpu.memory_space<vmem>>) attributes {dimension_semantics = [#tpu.dimension_semantics<parallel>], iteration_bounds = array<i64: 1>, scalar_prefetch = 0 : i64, scratch_operands = 0 : i64, tpu.core_type = #tpu.core_type<tc>, window_params = [{transform_indices = @transform_0, window_bounds = array<i64: 64, 128>}, {pipeline_mode = #tpu.pipeline_mode<synchronous>, transform_indices = @transform_1, window_bounds = array<i64: 8, 64>}, {pipeline_mode = #tpu.pipeline_mode<synchronous>, transform_indices = @transform_2, window_bounds = array<i64: 8, 1>}, {transform_indices = @transform_3, window_bounds = array<i64: 8, 128>}]} {
    %c0 = arith.constant 0 : index
    %c0_0 = arith.constant 0 : index
    %0 = vector.load %arg2[%c0, %c0_0] : memref<8x64xbf16, #tpu.memory_space<vmem>>, vector<8x64xbf16>
    %c0_1 = arith.constant 0 : index
    %c0_2 = arith.constant 0 : index
    %1 = vector.load %arg1[%c0_1, %c0_2] : memref<64x128xbf16, #tpu.memory_space<vmem>>, vector<64x128xbf16>
    %cst = arith.constant dense<0.000000e+00> : vector<8x128xf32>
    %2 = tpu.matmul %0, %1, %cst {dimension_numbers = #tpu.dot_dimension_numbers<[1], [0], [0], [1], [0, 0, 1, 1], [], []>} : vector<8x64xbf16>, vector<64x128xbf16>, vector<8x128xf32> -> vector<8x128xf32>
    %c0_3 = arith.constant 0 : index
    %c0_4 = arith.constant 0 : index
    %3 = vector.load %arg3[%c0_3, %c0_4] : memref<8x1xf32, #tpu.memory_space<vmem>>, vector<8x1xf32>
    %4 = vector.broadcast %3 : vector<8x1xf32> to vector<8x128xf32>
    %5 = arith.addf %2, %4 : vector<8x128xf32>
    %cst_5 = arith.constant 0.000000e+00 : f32
    %6 = vector.broadcast %cst_5 : f32 to vector<8x128xf32>
    %7 = arith.maximumf %5, %6 : vector<8x128xf32>
    %c0_6 = arith.constant 0 : index
    %c0_7 = arith.constant 0 : index
    %8 = vector.load %arg4[%c0_6, %c0_7] : memref<8x128xf32, #tpu.memory_space<vmem>>, vector<8x128xf32>
    tpu.vector_store %arg4[%c0_6, %c0_7], %7 {strides = array<i32>} : memref<8x128xf32, #tpu.memory_space<vmem>>, vector<8x128xf32>,
    return
  }
  func.func @transform_0(%arg0: i32) -> (i32, i32) {
    %c0_i32 = arith.constant 0 : i32
    %c0_i32_0 = arith.constant 0 : i32
    return %c0_i32, %arg0 : i32, i32
  }
  func.func @transform_1(%arg0: i32) -> (i32, i32) {
    %c0_i32 = arith.constant 0 : i32
    %c0_i32_0 = arith.constant 0 : i32
    %c0_i32_1 = arith.constant 0 : i32
    return %c0_i32, %c0_i32_0 : i32, i32
  }
  func.func @transform_2(%arg0: i32) -> (i32, i32) {
    %c0_i32 = arith.constant 0 : i32
    %c0_i32_0 = arith.constant 0 : i32
    %c0_i32_1 = arith.constant 0 : i32
    return %c0_i32, %c0_i32_0 : i32, i32
  }
  func.func @transform_3(%arg0: i32) -> (i32, i32) {
    %c0_i32 = arith.constant 0 : i32
    %c0_i32_0 = arith.constant 0 : i32
    return %c0_i32, %arg0 : i32, i32
  }
}

module attributes {stable_mosaic.version = 11 : i64} {
  func.func @_conv_vpu_kernel(%arg0: i32, %arg1: memref<72x128xf32, #tpu.memory_space<vmem>>, %arg2: memref<72x1xf32, #tpu.memory_space<vmem>>, %arg3: memref<1x1xf32, #tpu.memory_space<vmem>>, %arg4: memref<1x128xf32, #tpu.memory_space<vmem>>) attributes {dimension_semantics = [#tpu.dimension_semantics<parallel>], iteration_bounds = array<i64: 1>, scalar_prefetch = 0 : i64, scratch_operands = 0 : i64, tpu.core_type = #tpu.core_type<tc>, window_params = [{transform_indices = @transform_0, window_bounds = array<i64: 72, 128>}, {pipeline_mode = #tpu.pipeline_mode<synchronous>, transform_indices = @transform_1, window_bounds = array<i64: 72, 1>}, {pipeline_mode = #tpu.pipeline_mode<synchronous>, transform_indices = @transform_2, window_bounds = array<i64: 1, 1>}, {transform_indices = @transform_3, window_bounds = array<i64: 1, 128>}]} {
    %c0 = arith.constant 0 : index
    %c0_0 = arith.constant 0 : index
    %0 = vector.load %arg1[%c0, %c0_0] : memref<72x128xf32, #tpu.memory_space<vmem>>, vector<72x128xf32>
    %c0_1 = arith.constant 0 : index
    %c0_2 = arith.constant 0 : index
    %1 = vector.load %arg2[%c0_1, %c0_2] : memref<72x1xf32, #tpu.memory_space<vmem>>, vector<72x1xf32>
    %2 = vector.broadcast %1 : vector<72x1xf32> to vector<72x128xf32>
    %3 = arith.mulf %0, %2 : vector<72x128xf32>
    %cst = arith.constant dense<0.000000e+00> : vector<128xf32>
    %4 = vector.multi_reduction <add>, %3, %cst [0] : vector<72x128xf32> to vector<128xf32>
    %5 = vector.shape_cast %4 : vector<128xf32> to vector<1x128xf32>
    %c0_3 = arith.constant 0 : index
    %c0_4 = arith.constant 0 : index
    %6 = vector.load %arg3[%c0_3, %c0_4] : memref<1x1xf32, #tpu.memory_space<vmem>>, vector<1x1xf32>
    %7 = vector.broadcast %6 : vector<1x1xf32> to vector<1x128xf32>
    %8 = arith.addf %5, %7 : vector<1x128xf32>
    %c0_5 = arith.constant 0 : index
    %c0_6 = arith.constant 0 : index
    %9 = vector.load %arg4[%c0_5, %c0_6] : memref<1x128xf32, #tpu.memory_space<vmem>>, vector<1x128xf32>
    tpu.vector_store %arg4[%c0_5, %c0_6], %8 {strides = array<i32>} : memref<1x128xf32, #tpu.memory_space<vmem>>, vector<1x128xf32>,
    return
  }
  func.func @transform_0(%arg0: i32) -> (i32, i32) {
    %c0_i32 = arith.constant 0 : i32
    %c0_i32_0 = arith.constant 0 : i32
    return %c0_i32, %arg0 : i32, i32
  }
  func.func @transform_1(%arg0: i32) -> (i32, i32) {
    %c0_i32 = arith.constant 0 : i32
    %c0_i32_0 = arith.constant 0 : i32
    %c0_i32_1 = arith.constant 0 : i32
    return %c0_i32, %c0_i32_0 : i32, i32
  }
  func.func @transform_2(%arg0: i32) -> (i32, i32) {
    %c0_i32 = arith.constant 0 : i32
    %c0_i32_0 = arith.constant 0 : i32
    %c0_i32_1 = arith.constant 0 : i32
    return %c0_i32, %c0_i32_0 : i32, i32
  }
  func.func @transform_3(%arg0: i32) -> (i32, i32) {
    %c0_i32 = arith.constant 0 : i32
    %c0_i32_0 = arith.constant 0 : i32
    return %c0_i32, %arg0 : i32, i32
  }
}

module attributes {stable_mosaic.version = 11 : i64} {
  func.func @_conv_vpu_kernel(%arg0: i32, %arg1: memref<9x512xf32, #tpu.memory_space<vmem>>, %arg2: memref<9x1xf32, #tpu.memory_space<vmem>>, %arg3: memref<1x1xf32, #tpu.memory_space<vmem>>, %arg4: memref<1x512xf32, #tpu.memory_space<vmem>>) attributes {dimension_semantics = [#tpu.dimension_semantics<parallel>], iteration_bounds = array<i64: 1>, scalar_prefetch = 0 : i64, scratch_operands = 0 : i64, tpu.core_type = #tpu.core_type<tc>, window_params = [{transform_indices = @transform_0, window_bounds = array<i64: 9, 512>}, {pipeline_mode = #tpu.pipeline_mode<synchronous>, transform_indices = @transform_1, window_bounds = array<i64: 9, 1>}, {pipeline_mode = #tpu.pipeline_mode<synchronous>, transform_indices = @transform_2, window_bounds = array<i64: 1, 1>}, {transform_indices = @transform_3, window_bounds = array<i64: 1, 512>}]} {
    %c0 = arith.constant 0 : index
    %c0_0 = arith.constant 0 : index
    %0 = vector.load %arg1[%c0, %c0_0] : memref<9x512xf32, #tpu.memory_space<vmem>>, vector<9x512xf32>
    %c0_1 = arith.constant 0 : index
    %c0_2 = arith.constant 0 : index
    %1 = vector.load %arg2[%c0_1, %c0_2] : memref<9x1xf32, #tpu.memory_space<vmem>>, vector<9x1xf32>
    %2 = vector.broadcast %1 : vector<9x1xf32> to vector<9x512xf32>
    %3 = arith.mulf %0, %2 : vector<9x512xf32>
    %cst = arith.constant dense<0.000000e+00> : vector<512xf32>
    %4 = vector.multi_reduction <add>, %3, %cst [0] : vector<9x512xf32> to vector<512xf32>
    %5 = vector.shape_cast %4 : vector<512xf32> to vector<1x512xf32>
    %c0_3 = arith.constant 0 : index
    %c0_4 = arith.constant 0 : index
    %6 = vector.load %arg3[%c0_3, %c0_4] : memref<1x1xf32, #tpu.memory_space<vmem>>, vector<1x1xf32>
    %7 = vector.broadcast %6 : vector<1x1xf32> to vector<1x512xf32>
    %8 = arith.addf %5, %7 : vector<1x512xf32>
    %cst_5 = arith.constant 0.000000e+00 : f32
    %9 = vector.broadcast %cst_5 : f32 to vector<1x512xf32>
    %10 = arith.subf %9, %8 : vector<1x512xf32>
    %11 = math.exp %10 : vector<1x512xf32>
    %cst_6 = arith.constant 1.000000e+00 : f32
    %12 = vector.broadcast %cst_6 : f32 to vector<1x512xf32>
    %13 = arith.addf %12, %11 : vector<1x512xf32>
    %14 = tpu.reciprocal %13 {approx = true} : vector<1x512xf32> -> vector<1x512xf32>
    %c0_7 = arith.constant 0 : index
    %c0_8 = arith.constant 0 : index
    %15 = vector.load %arg4[%c0_7, %c0_8] : memref<1x512xf32, #tpu.memory_space<vmem>>, vector<1x512xf32>
    tpu.vector_store %arg4[%c0_7, %c0_8], %14 {strides = array<i32>} : memref<1x512xf32, #tpu.memory_space<vmem>>, vector<1x512xf32>,
    return
  }
  func.func @transform_0(%arg0: i32) -> (i32, i32) {
    %c0_i32 = arith.constant 0 : i32
    %c0_i32_0 = arith.constant 0 : i32
    return %c0_i32, %arg0 : i32, i32
  }
  func.func @transform_1(%arg0: i32) -> (i32, i32) {
    %c0_i32 = arith.constant 0 : i32
    %c0_i32_0 = arith.constant 0 : i32
    %c0_i32_1 = arith.constant 0 : i32
    return %c0_i32, %c0_i32_0 : i32, i32
  }
  func.func @transform_2(%arg0: i32) -> (i32, i32) {
    %c0_i32 = arith.constant 0 : i32
    %c0_i32_0 = arith.constant 0 : i32
    %c0_i32_1 = arith.constant 0 : i32
    return %c0_i32, %c0_i32_0 : i32, i32
  }
  func.func @transform_3(%arg0: i32) -> (i32, i32) {
    %c0_i32 = arith.constant 0 : i32
    %c0_i32_0 = arith.constant 0 : i32
    return %c0_i32, %arg0 : i32, i32
  }
}

</mosaic_0001>

<bundles_post_ra>
// kernel: conv_vae_forward.7
= control target key start
LH: loop header
LB: loop body
LE: loop exit
PB: predicated region body
PF: predicated region fallthrough
CT: control target
= control target key end

     0   :  { %vm39_vm0 = vcmask 1043456   ;;  %vm40_vm1 = vcmask 1044480   ;;  %v310_v1 = vmov 0   ;;  %v311_v2 = vmov 65535   ;;  %s383_s0 = inlined_call_operand.vmem [shape: bf16[9,256], index: 0, kind: input, shape index: {}]   ;;  %s384_s1 = inlined_call_operand.vmem [shape: bf16[9,256], index: 1, kind: input, shape index: {}]   ;;  %s385_s2 = inlined_call_operand.vmem [shape: bf16[9,256], index: 2, kind: input, shape index: {}]   ;;  %s386_s5 = inlined_call_operand.vmem [shape: f32[8,1], index: 5, kind: input, shape index: {}]   ;;  %s387_s3 = inlined_call_operand.vmem [shape: bf16[9,256], index: 3, kind: input, shape index: {}]   ;;  %s388_s4 = inlined_call_operand.vmem [shape: bf16[8,9], index: 4, kind: input, shape index: {}]   ;;  %s389_s6 = inlined_call_operand.vmem [shape: f32[8,256], index: 6, kind: output, shape index: {}]  }
   0x1   :  { %v298_v0 = vld [vmem:[%s383_s0 + $0x4] ss:$8 sps:$4 sm:$0x1f]   ;;  %81 = vmatprep.mubr.bf16.mxu0 %v310_v1  ;;  %138 = vmatprep.mubr.bf16.mxu1 %v310_v1  ;;  %v41_v3 = vsel %vm39_vm0, 4294967295, %v311_v2  ;;  %v24_v17 = vld [vmem:[%s388_s4] sm:$0xf] }
   0x2   :  { %297 = vset.pattern.permute.xlu0 %v310_v1  ;;  %v42_v4 = vsel %vm40_vm1, %v41_v3, 0  ;;  %v300_v5 = vld [vmem:[%s384_s1 + $0x4] ss:$8 sps:$4 sm:$0x1f]   ;;  %vm35_vm2 = vcmask 72704  }
   0x3   :  { %v47_v6 = vand.u32 %v298_v0, %v42_v4  ;;  %v302_v7 = vld [vmem:[%s383_s0] ss:$8 sps:$4 sm:$0x1f]   ;;  %v104_v9 = vand.u32 %v300_v5, %v42_v4  ;;  %v306_v13 = vld [vmem:[%s385_s2 + $0x4] ss:$8 sps:$4 sm:$0x1f]  }
   0x4   :  { %v303_v8 = vld [vmem:[%s384_s1] ss:$8 sps:$4 sm:$0x1f]   ;;  %v44_v11 = vand.u32 %v302_v7, %v42_v4  ;;  %v309_v16 = vld [vmem:[%s387_s3 + $0x4] ss:$8 sps:$4 sm:$0x1f]   ;;  %v163_v18 = vand.u32 %v306_v13, %v42_v4 }
   0x5   :  { %v304_v10 = vld [vmem:[%s385_s2] ss:$8 sps:$4 sm:$0x1f]   ;;  %49 = vmatprep.subr.bf16.mxu0 %v47_v6  ;;  %v101_v12 = vand.u32 %v303_v8, %v42_v4  ;;  %106 = vmatprep.subr.bf16.mxu1 %v104_v9  ;;  %v222_v20 = vand.u32 %v309_v16, %v42_v4 }
   0x6   :  { %v267_v14 = vld [vmem:[%s386_s5] sm:$0xff]  ;;  %50 = vmatpush1.bf16.msra.mxu0 %v44_v11  ;;  %v160_v19 = vand.u32 %v304_v10, %v42_v4 }
   0x7   :  { %v307_v15 = vld [vmem:[%s387_s3] ss:$8 sps:$4 sm:$0x1f]   ;;  %270 = vperm.xlu0 %297, %v267_v14   ;;  %107 = vmatpush1.bf16.msra.mxu1 %v101_v12 }
   0x8   :  { %v219_v21 = vand.u32 %v307_v15, %v42_v4  ;;  %165 = vmatprep.subr.bf16.mxu0 %v163_v18  ;;  %224 = vmatprep.subr.bf16.mxu1 %v222_v20 }
   0x9   :  { %285 = vmatmul.mubr.msk.bf16.vlgmr.msra.gmra.mrb[0].mxu0 %vm35_vm2, %v24_v17 }
   0xa   :  { %288 = vmatmul.mubr.msk.bf16.vlgmr.msra.gmra.mrb[0].mxu1 %vm35_vm2, %v24_v17  ;;  %166 = vmatpush1.bf16.msra.mxu0 %v160_v19 }
   0xb   :  { %225 = vmatpush1.bf16.msra.mxu1 %v219_v21  ;;  %197 = vmatprep.mubr.bf16.mxu0 %v310_v1 }
   0xc   :  { %256 = vmatprep.mubr.bf16.mxu1 %v310_v1 }
  0x11   :  { %291 = vmatmul.mubr.msk.bf16.vlgmr.msra.gmra.mrb[4].mxu0 %vm35_vm2, %v24_v17 }
  0x12   :  { %294 = vmatmul.mubr.msk.bf16.vlgmr.msra.gmra.mrb[4].mxu1 %vm35_vm2, %v24_v17 }
  0x86   :  { %v271_v32 = vpop.permute.xlu0 %270 }
  0xdc   :  { %v83_v22 = vpop.f32.mrb[0].mxu0 }
  0xdd   :  { %v140_v23 = vpop.f32.mrb[0].mxu1  ;;  %v85_v25 = vpop.f32.mrb[1].mxu0 }
  0xde   :  { %v147_v24 = vmax.f32 %v83_v22, %v140_v23  ;;  %v142_v26 = vpop.f32.mrb[1].mxu1  ;;  %v87_v28 = vpop.f32.mrb[2].mxu0 }
  0xdf   :  { %v148_v27 = vmax.f32 %v85_v25, %v142_v26  ;;  %v144_v29 = vpop.f32.mrb[2].mxu1  ;;  %v88_v30 = vpop.f32.mrb[3].mxu0 }
  0xe0   :  { %v145_v31 = vpop.f32.mrb[3].mxu1 }
  0xe4   :  { %v199_v33 = vpop.f32.mrb[4].mxu0 }
  0xe5   :  { %v258_v34 = vpop.f32.mrb[4].mxu1  ;;  %v206_v35 = vmax.f32 %v147_v24, %v199_v33  ;;  %v201_v36 = vpop.f32.mrb[5].mxu0 }
  0xe6   :  { %v260_v37 = vpop.f32.mrb[5].mxu1  ;;  %v207_v38 = vmax.f32 %v148_v27, %v201_v36  ;;  %v203_v39 = vpop.f32.mrb[6].mxu0 }
  0xe7   :  { %v262_v40 = vpop.f32.mrb[6].mxu1  ;;  %v265_v41 = vmax.f32 %v206_v35, %v258_v34  ;;  %v204_v42 = vpop.f32.mrb[7].mxu0 }
  0xe8   :  { %v263_v43 = vpop.f32.mrb[7].mxu1  ;;  %v266_v44 = vmax.f32 %v207_v38, %v260_v37 }
  0xe9   :  { %v273_v45 = vadd.f32 %v271_v32, %v265_v41 }
  0xea   :  { %v274_v46 = vadd.f32 %v271_v32, %v266_v44 }
  0xeb   :  { %v275_v47 = vmax.f32 %v273_v45, 0.0 }
  0xec   :  { %v276_v48 = vmax.f32 %v274_v46, 0.0 }
  0xed   :  { %277 = vst [vmem:[%s389_s6] sm:$0xff] %v275_v47 }
  0xee   :  { %278 = vst [vmem:[%s389_s6 + $0x8] sm:$0xff] %v276_v48 }

// kernel: conv_vae_forward.8
= control target key start
LH: loop header
LB: loop body
LE: loop exit
PB: predicated region body
PF: predicated region fallthrough
CT: control target
= control target key end

     0   :  { %v514_v0 = vmov 0.0   ;;  %vm515_vm0 = vmmov 0   ;;  %v516_v4 = vmov 0   ;;  %vm71_vm1 = vcmask 1043456   ;;  %s663_s0 = inlined_call_operand.vmem [shape: bf16[72,128], index: 0, kind: input, shape index: {}]   ;;  %s664_s1 = inlined_call_operand.vmem [shape: bf16[72,128], index: 1, kind: input, shape index: {}]   ;;  %s665_s4 = inlined_call_operand.vmem [shape: bf16[16,72], index: 4, kind: input, shape index: {}]   ;;  %s666_s2 = inlined_call_operand.vmem [shape: bf16[72,128], index: 2, kind: input, shape index: {}]   ;;  %s667_s3 = inlined_call_operand.vmem [shape: bf16[72,128], index: 3, kind: input, shape index: {}]   ;;  %s668_s5 = inlined_call_operand.vmem [shape: f32[16,1], index: 5, kind: input, shape index: {}]   ;;  %s669_s6 = inlined_call_operand.vmem [shape: f32[16,128], index: 6, kind: output, shape index: {}]  }
   0x1   :  { %433 = vmatprep.subr.bf16.mxu0 %v514_v0  ;;  %447 = vmatprep.subr.bf16.mxu1 %v514_v0  ;;  %v493_v1 = vld [vmem:[%s663_s0] sm:$0xff]   ;;  %v495_v3 = vld [vmem:[%s663_s0 + $0x8] sm:$0xff]   ;;  %v497_v6 = vld [vmem:[%s663_s0 + $0x10] sm:$0xff]   ;;  %vm67_vm2 = vcmask 588800  }
   0x2   :  { %v494_v2 = vld [vmem:[%s664_s1] sm:$0xff]   ;;  %443 = vmatprep.mubr.msk.bf16.mxu0 %vm515_vm0, %v514_v0  ;;  %457 = vmatprep.mubr.msk.bf16.mxu1 %vm515_vm0, %v514_v0  ;;  %v496_v5 = vld [vmem:[%s664_s1 + $0x8] sm:$0xff]   ;;  %v498_v7 = vld [vmem:[%s664_s1 + $0x10] sm:$0xff]  }
   0x3   :  { %434 = vmatpush3.bf16.msra.mxu0 %v493_v1  ;;  %492 = vset.pattern.permute.xlu0 %v516_v4  ;;  %v499_v8 = vld [vmem:[%s663_s0 + $0x18] sm:$0xff]   ;;  %v501_v10 = vld [vmem:[%s663_s0 + $0x20] ss:$0 sps:$4 sm:$0xff]   ;;  %v506_v18 = vld [vmem:[%s666_s2 + $0x8] sm:$0xff]  }
   0x4   :  { %448 = vmatpush3.bf16.msra.mxu1 %v494_v2  ;;  %435 = vmatprep.subr.bf16.mxu0 %v514_v0  ;;  %v500_v9 = vld [vmem:[%s664_s1 + $0x18] sm:$0xff]   ;;  %v502_v11 = vld [vmem:[%s664_s1 + $0x20] ss:$0 sps:$4 sm:$0xff]   ;;  %v73_v12 = vsel %vm71_vm1, %v501_v10, 0  ;;  %v363_v19 = vld [vmem:[%s668_s5 + $0x8] sm:$0xff] }
   0x5   :  { %449 = vmatprep.subr.bf16.mxu1 %v514_v0  ;;  %v153_v13 = vsel %vm71_vm1, %v502_v11, 0  ;;  %v503_v14 = vld [vmem:[%s665_s4] sm:$0xff]   ;;  %v507_v20 = vld [vmem:[%s667_s3 + $0x8] sm:$0xff]   ;;  %v508_v21 = vld [vmem:[%s666_s2 + $0x10] sm:$0xff]  }
   0x6   :  { %v504_v15 = vld [vmem:[%s666_s2] sm:$0xff]   ;;  %v509_v22 = vld [vmem:[%s667_s3 + $0x10] sm:$0xff]   ;;  %v510_v23 = vld [vmem:[%s666_s2 + $0x18] sm:$0xff]  }
   0x7   :  { %436 = vmatpush3.bf16.msra.mxu0 %v495_v3  ;;  %v505_v16 = vld [vmem:[%s667_s3] sm:$0xff]   ;;  %v511_v24 = vld [vmem:[%s667_s3 + $0x18] sm:$0xff]  }
   0x8   :  { %450 = vmatpush3.bf16.msra.mxu1 %v496_v5  ;;  %437 = vmatprep.subr.bf16.mxu0 %v514_v0  ;;  %v362_v17 = vld [vmem:[%s668_s5] sm:$0xff] }
   0x9   :  { %451 = vmatprep.subr.bf16.mxu1 %v514_v0  ;;  %366 = vperm.xlu0 %492, %v362_v17   ;;  %v512_v25 = vld [vmem:[%s666_s2 + $0x20] ss:$0 sps:$4 sm:$0xff]  }
   0xa   :  { %v513_v26 = vld [vmem:[%s667_s3 + $0x20] ss:$0 sps:$4 sm:$0xff]   ;;  %v235_v27 = vsel %vm71_vm1, %v512_v25, 0 }
   0xb   :  { %438 = vmatpush3.bf16.msra.mxu0 %v497_v6  ;;  %v317_v28 = vsel %vm71_vm1, %v513_v26, 0 }
   0xc   :  { %452 = vmatpush3.bf16.msra.mxu1 %v498_v7  ;;  %439 = vmatprep.subr.bf16.mxu0 %v514_v0 }
   0xd   :  { %453 = vmatprep.subr.bf16.mxu1 %v514_v0  ;;  %371 = vperm.xlu0 %492, %v363_v19  }
   0xf   :  { %440 = vmatpush3.bf16.msra.mxu0 %v499_v8 }
  0x10   :  { %454 = vmatpush3.bf16.msra.mxu1 %v500_v9  ;;  %441 = vmatprep.subr.bf16.mxu0 %v514_v0 }
  0x11   :  { %455 = vmatprep.subr.bf16.mxu1 %v514_v0 }
  0x13   :  { %442 = vmatpush3.bf16.msra.mxu0 %v73_v12 }
  0x14   :  { %456 = vmatpush3.bf16.msra.mxu1 %v153_v13  ;;  %461 = vmatprep.subr.bf16.mxu0 %v514_v0 }
  0x15   :  { %475 = vmatprep.subr.bf16.mxu1 %v514_v0 }
  0x16   :  { %444 = vmatmul.mubr.msk.bf16.vlgmr.msra.gmra.mrb[0].mxu0 %vm67_vm2, %v503_v14 }
  0x17   :  { %458 = vmatmul.mubr.msk.bf16.vlgmr.msra.gmra.mrb[0].mxu1 %vm67_vm2, %v503_v14  ;;  %462 = vmatpush3.bf16.msra.mxu0 %v504_v15 }
  0x18   :  { %476 = vmatpush3.bf16.msra.mxu1 %v505_v16  ;;  %463 = vmatprep.subr.bf16.mxu0 %v514_v0 }
  0x19   :  { %477 = vmatprep.subr.bf16.mxu1 %v514_v0  ;;  %471 = vmatprep.mubr.msk.bf16.mxu0 %vm515_vm0, %v514_v0 }
  0x1a   :  { %485 = vmatprep.mubr.msk.bf16.mxu1 %vm515_vm0, %v514_v0 }
  0x1b   :  { %464 = vmatpush3.bf16.msra.mxu0 %v506_v18 }
  0x1c   :  { %478 = vmatpush3.bf16.msra.mxu1 %v507_v20  ;;  %465 = vmatprep.subr.bf16.mxu0 %v514_v0 }
  0x1d   :  { %479 = vmatprep.subr.bf16.mxu1 %v514_v0 }
  0x1f   :  { %466 = vmatpush3.bf16.msra.mxu0 %v508_v21 }
  0x20   :  { %480 = vmatpush3.bf16.msra.mxu1 %v509_v22  ;;  %467 = vmatprep.subr.bf16.mxu0 %v514_v0 }
  0x21   :  { %481 = vmatprep.subr.bf16.mxu1 %v514_v0 }
  0x23   :  { %468 = vmatpush3.bf16.msra.mxu0 %v510_v23 }
  0x24   :  { %482 = vmatpush3.bf16.msra.mxu1 %v511_v24  ;;  %469 = vmatprep.subr.bf16.mxu0 %v514_v0 }
  0x25   :  { %483 = vmatprep.subr.bf16.mxu1 %v514_v0 }
  0x27   :  { %470 = vmatpush3.bf16.msra.mxu0 %v235_v27 }
  0x28   :  { %484 = vmatpush3.bf16.msra.mxu1 %v317_v28 }
  0x2a   :  { %472 = vmatmul.mubr.msk.bf16.vlgmr.msra.gmra.mrb[4].mxu0 %vm67_vm2, %v503_v14 }
  0x2b   :  { %486 = vmatmul.mubr.msk.bf16.vlgmr.msra.gmra.mrb[4].mxu1 %vm67_vm2, %v503_v14 }
  0x88   :  { %v367_v39 = vpop.permute.xlu0 %366 }
  0x8c   :  { %v372_v53 = vpop.permute.xlu0 %371 }
  0xe9   :  { %v109_v29 = vpop.f32.mrb[0].mxu0 }
  0xea   :  { %v189_v30 = vpop.f32.mrb[0].mxu1  ;;  %v445_v31 = vpop.f32.mrb[1].mxu0 }
  0xeb   :  { %v196_v32 = vmax.f32 %v109_v29, %v189_v30  ;;  %v459_v33 = vpop.f32.mrb[1].mxu1  ;;  %v112_v34 = vpop.f32.mrb[2].mxu0 }
  0xec   :  { %v192_v35 = vpop.f32.mrb[2].mxu1  ;;  %v446_v36 = vpop.f32.mrb[3].mxu0 }
  0xed   :  { %v197_v37 = vmax.f32 %v112_v34, %v192_v35  ;;  %v460_v38 = vpop.f32.mrb[3].mxu1 }
  0xfd   :  { %v271_v40 = vpop.f32.mrb[4].mxu0 }
  0xfe   :  { %v278_v41 = vmax.f32 %v196_v32, %v271_v40  ;;  %v353_v42 = vpop.f32.mrb[4].mxu1  ;;  %v473_v43 = vpop.f32.mrb[5].mxu0 }
  0xff   :  { %v487_v44 = vpop.f32.mrb[5].mxu1  ;;  %v274_v45 = vpop.f32.mrb[6].mxu0 }
 0x100   :  { %v360_v46 = vmax.f32 %v278_v41, %v353_v42  ;;  %v279_v47 = vmax.f32 %v197_v37, %v274_v45  ;;  %v356_v48 = vpop.f32.mrb[6].mxu1  ;;  %v474_v49 = vpop.f32.mrb[7].mxu0 }
 0x101   :  { %v488_v50 = vpop.f32.mrb[7].mxu1 }
 0x102   :  { %v374_v51 = vadd.f32 %v367_v39, %v360_v46  ;;  %v361_v52 = vmax.f32 %v279_v47, %v356_v48 }
 0x104   :  { %v376_v54 = vmax.f32 %v374_v51, 0.0  ;;  %v375_v55 = vadd.f32 %v372_v53, %v361_v52 }
 0x106   :  { %378 = vst [vmem:[%s669_s6] sm:$0xff] %v376_v54  ;;  %v377_v56 = vmax.f32 %v375_v55, 0.0 }
 0x108   :  { %379 = vst [vmem:[%s669_s6 + $0x8] sm:$0xff] %v377_v56 }

// kernel: conv_vae_forward.9
= control target key start
LH: loop header
LB: loop body
LE: loop exit
PB: predicated region body
PF: predicated region fallthrough
CT: control target
= control target key end

     0   :  { %v362_v1 = vmov 0   ;;  %v363_v21 = vmov 0.0   ;;  %vm364_vm0 = vmmov 0   ;;  %vm209_vm1 = vcmask 64512   ;;  %s466_s0 = inlined_call_operand.vmem [shape: bf16[256,128], index: 0, kind: input, shape index: {}]   ;;  %s467_s1 = inlined_call_operand.vmem [shape: bf16[8,256], index: 1, kind: input, shape index: {}]   ;;  %s468_s2 = inlined_call_operand.vmem [shape: f32[8,1], index: 2, kind: input, shape index: {}]   ;;  %s469_s3 = inlined_call_operand.vmem [shape: f32[8,128], index: 3, kind: input, shape index: {}]   ;;  %s470_s5 = inlined_call_operand.vmem [shape: f32[8,128], index: 5, kind: output, shape index: {0}]   ;;  %s471_s4 = inlined_call_operand.vmem [shape: f32[4,8], index: 4, kind: input, shape index: {}]   ;;  %s472_s6 = inlined_call_operand.vmem [shape: f32[4,128], index: 6, kind: output, shape index: {1}]  }
   0x1   :  { %v344_v0 = vld [vmem:[%s466_s0 + $0x40] sm:$0xff]   ;;  %343 = vset.pattern.permute.xlu0 %v362_v1  ;;  %v346_v3 = vld [vmem:[%s466_s0 + $0x48] sm:$0xff]   ;;  %v348_v5 = vld [vmem:[%s466_s0 + $0x50] sm:$0xff]   ;;  %335 = vmatprep.subr.mxu1 %v363_v21 }
   0x2   :  { %v345_v2 = vld [vmem:[%s466_s0] sm:$0xff]   ;;  %311 = vmatprep.subr.bf16.mxu0 %v344_v0  ;;  %v347_v4 = vld [vmem:[%s466_s0 + $0x8] sm:$0xff]   ;;  %v349_v6 = vld [vmem:[%s466_s0 + $0x10] sm:$0xff]   ;;  %337 = vmatprep.mubr.msk.f32.mxu1 %vm364_vm0, %v363_v21 }
   0x3   :  { %312 = vmatpush3.bf16.msra.mxu0 %v345_v2  ;;  %v350_v7 = vld [vmem:[%s466_s0 + $0x58] sm:$0xff]   ;;  %v352_v9 = vld [vmem:[%s466_s0 + $0x60] sm:$0xff]   ;;  %v354_v11 = vld [vmem:[%s466_s0 + $0x68] sm:$0xff]  }
   0x4   :  { %313 = vmatprep.subr.bf16.mxu0 %v346_v3  ;;  %v351_v8 = vld [vmem:[%s466_s0 + $0x18] sm:$0xff]   ;;  %v353_v10 = vld [vmem:[%s466_s0 + $0x20] sm:$0xff]   ;;  %v355_v15 = vld [vmem:[%s466_s0 + $0x28] sm:$0xff]  }
   0x5   :  { %v23_v12 = vld [vmem:[%s467_s1] sm:$0xff]  ;;  %v356_v16 = vld [vmem:[%s466_s0 + $0x70] sm:$0xff]   ;;  %v358_v18 = vld [vmem:[%s466_s0 + $0x78] sm:$0xff]  }
   0x6   :  { %v56_v13 = vld [vmem:[%s468_s2] sm:$0xff]  ;;  %v293_v14 = vcombine.high %v23_v12, %v23_v12  ;;  %v357_v17 = vld [vmem:[%s466_s0 + $0x30] sm:$0xff]   ;;  %v359_v19 = vld [vmem:[%s466_s0 + $0x38] sm:$0xff]   ;;  %v292_v20 = vcombine.low %v23_v12, %v23_v12 }
   0x7   :  { %314 = vmatpush3.bf16.msra.mxu0 %v347_v4  ;;  %59 = vperm.xlu0 %343, %v56_v13   ;;  %v206_v28 = vld [vmem:[%s469_s3] sm:$0xff] }
   0x8   :  { %315 = vmatprep.subr.bf16.mxu0 %v348_v5  ;;  %197 = vmatprep.mubr.bf16.mxu0 %v293_v14  ;;  %v208_v31 = vld [vmem:[%s471_s4] sm:$0xf] }
   0xb   :  { %316 = vmatpush3.bf16.msra.mxu0 %v349_v6 }
   0xc   :  { %317 = vmatprep.subr.bf16.mxu0 %v350_v7 }
   0xf   :  { %318 = vmatpush3.bf16.msra.mxu0 %v351_v8 }
  0x10   :  { %319 = vmatprep.subr.bf16.mxu0 %v352_v9 }
  0x13   :  { %320 = vmatpush3.bf16.msra.mxu0 %v353_v10 }
  0x14   :  { %321 = vmatprep.subr.bf16.mxu0 %v354_v11 }
  0x17   :  { %322 = vmatpush3.bf16.msra.mxu0 %v355_v15 }
  0x18   :  { %323 = vmatprep.subr.bf16.mxu0 %v356_v16 }
  0x1b   :  { %324 = vmatpush3.bf16.msra.mxu0 %v357_v17 }
  0x1c   :  { %325 = vmatprep.subr.bf16.mxu0 %v358_v18 }
  0x1f   :  { %326 = vmatpush3.bf16.msra.mxu0 %v359_v19 }
  0x22   :  { %198 = vmatmul.mubr.bf16.vlgmr.msra.gmra.mrb[0].mxu0 %v292_v20 }
  0x86   :  { %v60_v24 = vpop.permute.xlu0 %59 }
  0xf5   :  { %v327_v22 = vpop.f32.mrb[0].mxu0 }
  0xf6   :  { %v328_v23 = vpop.f32.mrb[1].mxu0 }
  0xf7   :  { %v329_v25 = vadd.f32 %v328_v23, %v327_v22  ;;  %v330_v26 = vpop.f32.mrb[2].mxu0 }
  0xf8   :  { %v331_v27 = vpop.f32.mrb[3].mxu0 }
  0xf9   :  { %v200_v29 = vadd.f32 %v329_v25, %v60_v24 }
  0xfb   :  { %205 = vst [vmem:[%s470_s5] sm:$0xff] %v200_v29  ;;  %v207_v30 = vmul.f32 %v206_v28, %v200_v29 }
  0xfd   :  { %336 = vmatpush3.msra.mxu1 %v207_v30 }
  0xfe   :  { %338 = vmatmul.mubr.msk.f32.vlgmr.msra.gmra.mrb[0].mxu1 %vm209_vm1, %v208_v31 }
 0x1d1   :  { %v279_v32 = vpop.f32.mrb[0].mxu1 }
 0x1d2   :  { %283 = vst [vmem:[%s472_s6] sm:$0xf] %v279_v32  ;;  %v339_v33 = vpop.f32.mrb[1].mxu1 }

// kernel: conv_vae_forward.10
= control target key start
LH: loop header
LB: loop body
LE: loop exit
PB: predicated region body
PF: predicated region fallthrough
CT: control target
= control target key end

     0   :  { %v112_v0 = vmov 0.0   ;;  %vm113_vm0 = vmmov 0   ;;  %v114_v3 = vmov 0   ;;  %vm42_vm1 = vcmask 130048   ;;  %s153_s0 = inlined_call_operand.vmem [shape: bf16[16,128], index: 0, kind: input, shape index: {}]   ;;  %s154_s1 = inlined_call_operand.vmem [shape: bf16[16,16], index: 1, kind: input, shape index: {}]   ;;  %s155_s2 = inlined_call_operand.vmem [shape: f32[16,1], index: 2, kind: input, shape index: {}]   ;;  %s156_s3 = inlined_call_operand.vmem [shape: f32[16,128], index: 3, kind: output, shape index: {}]  }
   0x1   :  { %100 = vmatprep.subr.bf16.mxu0 %v112_v0  ;;  %v110_v1 = vld [vmem:[%s153_s0] sm:$0xff]   ;;  %102 = vmatprep.mubr.msk.bf16.mxu0 %vm113_vm0, %v112_v0  ;;  %v20_v5 = vld [vmem:[%s155_s2 + $0x8] sm:$0xff] }
   0x2   :  { %v111_v2 = vld [vmem:[%s154_s1] sm:$0xff]   ;;  %109 = vset.pattern.permute.xlu0 %v114_v3  ;;  %101 = vmatpush3.bf16.msra.mxu0 %v110_v1 }
   0x3   :  { %v19_v4 = vld [vmem:[%s155_s2] sm:$0xff] }
   0x4   :  { %23 = vperm.xlu0 %109, %v19_v4  }
   0x5   :  { %103 = vmatmul.mubr.msk.bf16.vlgmr.msra.gmra.mrb[0].mxu0 %vm42_vm1, %v111_v2 }
   0x8   :  { %28 = vperm.xlu0 %109, %v20_v5  }
  0x83   :  { %v24_v6 = vpop.permute.xlu0 %23 }
  0x87   :  { %v29_v10 = vpop.permute.xlu0 %28 }
  0xd8   :  { %v80_v7 = vpop.f32.mrb[0].mxu0 }
  0xd9   :  { %v81_v8 = vadd.f32 %v80_v7, %v24_v6  ;;  %v104_v9 = vpop.f32.mrb[1].mxu0 }
  0xda   :  { %v83_v11 = vpop.f32.mrb[2].mxu0 }
  0xdb   :  { %v87_v12 = vmax.f32 %v81_v8, 0.0  ;;  %v84_v13 = vadd.f32 %v83_v11, %v29_v10  ;;  %v105_v14 = vpop.f32.mrb[3].mxu0 }
  0xdd   :  { %89 = vst [vmem:[%s156_s3] sm:$0xff] %v87_v12  ;;  %v88_v15 = vmax.f32 %v84_v13, 0.0 }
  0xdf   :  { %90 = vst [vmem:[%s156_s3 + $0x8] sm:$0xff] %v88_v15 }

// kernel: conv_vae_forward.11
= control target key start
LH: loop header
LB: loop body
LE: loop exit
PB: predicated region body
PF: predicated region fallthrough
CT: control target
= control target key end

     0   :  { %v134_v0 = vmov 0.0   ;;  %vm135_vm0 = vmmov 0   ;;  %v136_v2 = vmov 0   ;;  %vm54_vm1 = vcmask 523264   ;;  %s178_s0 = inlined_call_operand.vmem [shape: bf16[64,128], index: 0, kind: input, shape index: {}]   ;;  %s179_s2 = inlined_call_operand.vmem [shape: f32[8,1], index: 2, kind: input, shape index: {}]   ;;  %s180_s1 = inlined_call_operand.vmem [shape: bf16[8,64], index: 1, kind: input, shape index: {}]   ;;  %s181_s3 = inlined_call_operand.vmem [shape: f32[8,128], index: 3, kind: output, shape index: {}]  }
   0x1   :  { %114 = vmatprep.subr.bf16.mxu0 %v134_v0  ;;  %v130_v1 = vld [vmem:[%s178_s0] sm:$0xff]   ;;  %122 = vmatprep.mubr.msk.bf16.mxu0 %vm135_vm0, %v134_v0  ;;  %v131_v3 = vld [vmem:[%s178_s0 + $0x8] sm:$0xff]   ;;  %v132_v5 = vld [vmem:[%s178_s0 + $0x10] sm:$0xff]  }
   0x2   :  { %129 = vset.pattern.permute.xlu0 %v136_v2  ;;  %115 = vmatpush3.bf16.msra.mxu0 %v130_v1  ;;  %v24_v4 = vld [vmem:[%s179_s2] sm:$0xff]  ;;  %v133_v6 = vld [vmem:[%s178_s0 + $0x18] sm:$0xff]  }
   0x3   :  { %116 = vmatprep.subr.bf16.mxu0 %v134_v0  ;;  %27 = vperm.xlu0 %129, %v24_v4   ;;  %v15_v7 = vld [vmem:[%s180_s1] sm:$0xf] }
   0x6   :  { %117 = vmatpush3.bf16.msra.mxu0 %v131_v3 }
   0x7   :  { %118 = vmatprep.subr.bf16.mxu0 %v134_v0 }
   0xa   :  { %119 = vmatpush3.bf16.msra.mxu0 %v132_v5 }
   0xb   :  { %120 = vmatprep.subr.bf16.mxu0 %v134_v0 }
   0xe   :  { %121 = vmatpush3.bf16.msra.mxu0 %v133_v6 }
  0x11   :  { %123 = vmatmul.mubr.msk.bf16.vlgmr.msra.gmra.mrb[0].mxu0 %vm54_vm1, %v15_v7 }
  0x82   :  { %v28_v8 = vpop.permute.xlu0 %27 }
  0xe4   :  { %v92_v9 = vpop.f32.mrb[0].mxu0 }
  0xe5   :  { %v93_v10 = vadd.f32 %v92_v9, %v28_v8  ;;  %v124_v11 = vpop.f32.mrb[1].mxu0 }
  0xe6   :  { %v95_v12 = vpop.f32.mrb[2].mxu0 }
  0xe7   :  { %v98_v13 = vmax.f32 %v93_v10, 0.0  ;;  %v125_v14 = vpop.f32.mrb[3].mxu0 }
  0xe9   :  { %99 = vst [vmem:[%s181_s3] sm:$0xff] %v98_v13 }

// kernel: conv_vae_forward.12
= control target key start
LH: loop header
LB: loop body
LE: loop exit
PB: predicated region body
PF: predicated region fallthrough
CT: control target
= control target key end

     0   :  { %v121_v0 = vmov 0   ;;  %v108_v46 = vlaneseq  ;;  %s202_s1 = inlined_call_operand.vmem [shape: f32[72,1], index: 1, kind: input, shape index: {}]   ;;  %s203_s2 = inlined_call_operand.<no memory space> [shape: f32[1,1], index: 2, kind: input, shape index: {}]   ;;  %s204_s0 = inlined_call_operand.vmem [shape: f32[72,128], index: 0, kind: input, shape index: {}]   ;;  %s205_s3 = inlined_call_operand.vmem [shape: f32[1,128], index: 3, kind: output, shape index: {}]  }
   0x1   :  { %120 = vset.pattern.permute.xlu1 %v121_v0  ;;  %119 = vset.pattern.permute.xlu0 %v121_v0  ;;  %v27_v1 = vld [vmem:[%s202_s1 + $0x10] sm:$0xff]  ;;  %v25_v2 = vld [vmem:[%s202_s1] sm:$0xff]  ;;  %v8_v3 = vstv %s203_s2  ;;  %v28_v4 = vld [vmem:[%s202_s1 + $0x18] sm:$0xff] }
   0x2   :  { %46 = vperm.xlu1 %120, %v27_v1   ;;  %36 = vperm.xlu0 %119, %v25_v2   ;;  %9 = vst [vmem:[#allocation2] sm:$0x1] %v8_v3  ;;  %v26_v5 = vld [vmem:[%s202_s1 + $0x8] sm:$0xff]  ;;  %v29_v7 = vld [vmem:[%s202_s1 + $0x20] sm:$0xff]  ;;  %v32_v8 = vld [vmem:[%s202_s1 + $0x38] sm:$0xff]  ;;  %v109_v49 = vshrl.u32 %v108_v46, 7 }
   0x3   :  { %v30_v6 = vld [vmem:[%s202_s1 + $0x28] sm:$0xff]  ;;  %v31_v9 = vld [vmem:[%s202_s1 + $0x30] sm:$0xff]  ;;  %v33_v11 = vld [vmem:[%s202_s1 + $0x40] sm:$0xff] }
   0x4   :  { %v16_v14 = vld [vmem:[%s204_s0] sm:$0xff]  ;;  %v17_v15 = vld [vmem:[%s204_s0 + $0x8] sm:$0xff]  ;;  %v18_v16 = vld [vmem:[%s204_s0 + $0x10] sm:$0xff]  ;;  %v110_v52 = vsub.s32 0, %v109_v49 }
   0x5   :  { %v19_v21 = vld [vmem:[%s204_s0 + $0x18] sm:$0xff]  ;;  %v20_v26 = vld [vmem:[%s204_s0 + $0x20] sm:$0xff]  ;;  %v21_v29 = vld [vmem:[%s204_s0 + $0x28] sm:$0xff] }
   0x6   :  { %51 = vperm.xlu1 %120, %v28_v4   ;;  %41 = vperm.xlu0 %119, %v26_v5   ;;  %v22_v33 = vld [vmem:[%s204_s0 + $0x30] sm:$0xff]  ;;  %v23_v37 = vld [vmem:[%s204_s0 + $0x38] sm:$0xff]  ;;  %v24_v41 = vld [vmem:[%s204_s0 + $0x40] sm:$0xff] }
   0x9   :  { %v102_v10 = vld [vmem:[#allocation2] sm:$0x1] }
   0xa   :  { %61 = vperm.xlu1 %120, %v30_v6   ;;  %56 = vperm.xlu0 %119, %v29_v7  }
   0xe   :  { %71 = vperm.xlu1 %120, %v32_v8   ;;  %66 = vperm.xlu0 %119, %v31_v9  }
  0x12   :  { %105 = vperm.xlu1 %120, %v102_v10   ;;  %76 = vperm.xlu0 %119, %v33_v11  }
  0x81   :  { %v47_v12 = vpop.permute.xlu1 %46  ;;  %v37_v13 = vpop.permute.xlu0 %36 }
  0x82   :  { %v79_v19 = vmul.f32 %v37_v13, %v16_v14  ;;  %v81_v22 = vmul.f32 %v47_v12, %v18_v16 }
  0x85   :  { %v52_v17 = vpop.permute.xlu1 %51  ;;  %v42_v18 = vpop.permute.xlu0 %41 }
  0x86   :  { %v80_v20 = vmul.f32 %v42_v18, %v17_v15  ;;  %v82_v27 = vmul.f32 %v52_v17, %v19_v21 }
  0x88   :  { %v88_v23 = vadd.f32 %v80_v20, %v79_v19 }
  0x89   :  { %v62_v24 = vpop.permute.xlu1 %61  ;;  %v57_v25 = vpop.permute.xlu0 %56 }
  0x8a   :  { %v89_v28 = vadd.f32 %v88_v23, %v81_v22  ;;  %v83_v30 = vmul.f32 %v57_v25, %v20_v26  ;;  %v84_v34 = vmul.f32 %v62_v24, %v21_v29 }
  0x8c   :  { %v90_v31 = vadd.f32 %v89_v28, %v82_v27 }
  0x8d   :  { %v67_v32 = vpop.permute.xlu0 %66  ;;  %v72_v36 = vpop.permute.xlu1 %71 }
  0x8e   :  { %v91_v35 = vadd.f32 %v90_v31, %v83_v30  ;;  %v85_v38 = vmul.f32 %v67_v32, %v22_v33  ;;  %v86_v42 = vmul.f32 %v72_v36, %v23_v37 }
  0x90   :  { %v92_v39 = vadd.f32 %v91_v35, %v84_v34 }
  0x91   :  { %v77_v40 = vpop.permute.xlu0 %76  ;;  %v106_v54 = vpop.permute.xlu1 %105 }
  0x92   :  { %v93_v43 = vadd.f32 %v92_v39, %v85_v38  ;;  %v87_v44 = vmul.f32 %v77_v40, %v24_v41  ;;  %v111_v56 = vrot.slane %v106_v54, %v110_v52 }
  0x94   :  { %v94_v45 = vadd.f32 %v93_v43, %v86_v42 }
  0x96   :  { %v95_v47 = vadd.f32 %v94_v45, %v87_v44 }
  0x98   :  { %v96_v48 = vrot.slane %v95_v47, 4 }
  0x9a   :  { %v97_v50 = vadd.f32 %v96_v48, %v95_v47 }
  0x9c   :  { %v98_v51 = vrot.slane %v97_v50, 2 }
  0x9e   :  { %v99_v53 = vadd.f32 %v98_v51, %v97_v50 }
  0xa0   :  { %v100_v55 = vrot.slane %v99_v53, 1 }
  0xa2   :  { %v101_v57 = vadd.f32 %v100_v55, %v99_v53 }
  0xa4   :  { %v112_v58 = vadd.f32 %v111_v56, %v101_v57 }
  0xa6   :  { %113 = vst [vmem:[%s205_s3] sm:$0x1] %v112_v58 }

// kernel: conv_vae_forward.13
= control target key start
LH: loop header
LB: loop body
LE: loop exit
PB: predicated region body
PF: predicated region fallthrough
CT: control target
= control target key end

     0   :  { %v169_v0 = vmov 0   ;;  %vm44_vm0 = vcmask 1040384   ;;  %v83_v19 = vlaneseq  ;;  %s229_s1 = inlined_call_operand.vmem [shape: f32[9,1], index: 1, kind: input, shape index: {}]   ;;  %s230_s2 = inlined_call_operand.<no memory space> [shape: f32[1,1], index: 2, kind: input, shape index: {}]   ;;  %s231_s0 = inlined_call_operand.vmem [shape: f32[9,512], index: 0, kind: input, shape index: {}]   ;;  %s232_s3 = inlined_call_operand.vmem [shape: f32[1,512], index: 3, kind: output, shape index: {}]  }
   0x1   :  { %151 = vset.pattern.permute.xlu0 %v169_v0  ;;  %v25_v1 = vld [vmem:[%s229_s1 + $0x8] sm:$0x1]  ;;  %152 = vset.pattern.permute.xlu1 %v169_v0  ;;  %v8_v2 = vstv %s230_s2  ;;  %v24_v3 = vld [vmem:[%s229_s1] sm:$0xff]  ;;  %v22_v7 = vld [vmem:[%s231_s0 + $0x30] sm:$0x1] }
   0x2   :  { %33 = vperm.xlu0 %151, %v25_v1   ;;  %9 = vst [vmem:[#allocation2] sm:$0x1] %v8_v2  ;;  %v20_v5 = vld [vmem:[%s231_s0 + $0x20] sm:$0x1]  ;;  %v21_v6 = vld [vmem:[%s231_s0 + $0x28] sm:$0x1] }
   0x3   :  { %v23_v8 = vld [vmem:[%s231_s0 + $0x38] sm:$0x1]  ;;  %v16_v10 = vld [vmem:[%s231_s0] sm:$0xff]  ;;  %v17_v15 = vld [vmem:[%s231_s0 + $0x8] sm:$0xff]  ;;  %v84_v32 = vshrl.u32 %v83_v19, 7  ;;  %vm142_vm1 = vcmp.lt.s32.totalorder %v83_v19, 512 }
   0x4   :  { %v18_v16 = vld [vmem:[%s231_s0 + $0x10] sm:$0xff]  ;;  %v19_v17 = vld [vmem:[%s231_s0 + $0x18] sm:$0xff] }
   0x5   :  { %v85_v41 = vsub.s32 0, %v84_v32 }
   0x6   :  { %28 = vperm.xlu0 %151, %v24_v3  }
   0x9   :  { %v77_v4 = vld [vmem:[#allocation2] sm:$0x1] }
   0xa   :  { %80 = vperm.xlu1 %152, %v77_v4  }
  0x81   :  { %v34_v9 = vpop.permute.xlu0 %33 }
  0x82   :  { %v40_v11 = vmul.f32 %v34_v9, %v20_v5  ;;  %v41_v12 = vmul.f32 %v34_v9, %v21_v6  ;;  %v42_v13 = vmul.f32 %v34_v9, %v22_v7  ;;  %v43_v14 = vmul.f32 %v34_v9, %v23_v8 }
  0x84   :  { %v45_v24 = vsel %vm44_vm0, %v40_v11, 0.0  ;;  %v53_v25 = vsel %vm44_vm0, %v41_v12, 0.0  ;;  %v61_v26 = vsel %vm44_vm0, %v42_v13, 0.0  ;;  %v69_v27 = vsel %vm44_vm0, %v43_v14, 0.0 }
  0x85   :  { %v29_v18 = vpop.permute.xlu0 %28 }
  0x86   :  { %v36_v20 = vmul.f32 %v29_v18, %v16_v10  ;;  %v37_v21 = vmul.f32 %v29_v18, %v17_v15  ;;  %v38_v22 = vmul.f32 %v29_v18, %v18_v16  ;;  %v39_v23 = vmul.f32 %v29_v18, %v19_v17 }
  0x87   :  { %v170_v16 = vmov 1966171168  }
  0x88   :  { %v46_v28 = vadd.f32 %v45_v24, %v36_v20  ;;  %v54_v29 = vadd.f32 %v53_v25, %v37_v21  ;;  %v62_v30 = vadd.f32 %v61_v26, %v38_v22  ;;  %v70_v31 = vadd.f32 %v69_v27, %v39_v23 }
  0x89   :  { %v81_v46 = vpop.permute.xlu1 %80  ;;  %v118_v17 = vunpack.c.l.s4 %v170_v16 }
  0x8a   :  { %v47_v33 = vrot.slane %v46_v28, 4  ;;  %v55_v34 = vrot.slane %v54_v29, 4  ;;  %v63_v35 = vrot.slane %v62_v30, 4  ;;  %v71_v36 = vrot.slane %v70_v31, 4 }
  0x8b   :  { %v86_v51 = vrot.slane %v81_v46, %v85_v41  ;;  %v119_v18 = vunpack.c.0.s8 %v118_v17 }
  0x8c   :  { %v48_v37 = vadd.f32 %v47_v33, %v46_v28  ;;  %v56_v38 = vadd.f32 %v55_v34, %v54_v29  ;;  %v64_v39 = vadd.f32 %v63_v35, %v62_v30  ;;  %v72_v40 = vadd.f32 %v71_v36, %v70_v31 }
  0x8d   :  { %v122_v21 = vsub.s32 %v119_v18, %v84_v32 }
  0x8e   :  { %v49_v42 = vrot.slane %v48_v37, 2  ;;  %v57_v43 = vrot.slane %v56_v38, 2  ;;  %v65_v44 = vrot.slane %v64_v39, 2  ;;  %v73_v45 = vrot.slane %v72_v40, 2 }
  0x90   :  { %v50_v47 = vadd.f32 %v49_v42, %v48_v37  ;;  %v58_v48 = vadd.f32 %v57_v43, %v56_v38  ;;  %v66_v49 = vadd.f32 %v65_v44, %v64_v39  ;;  %v74_v50 = vadd.f32 %v73_v45, %v72_v40 }
  0x92   :  { %v51_v52 = vrot.slane %v50_v47, 1  ;;  %v59_v53 = vrot.slane %v58_v48, 1  ;;  %v67_v54 = vrot.slane %v66_v49, 1  ;;  %v75_v55 = vrot.slane %v74_v50, 1 }
  0x94   :  { %v52_v56 = vadd.f32 %v51_v52, %v50_v47  ;;  %v60_v57 = vadd.f32 %v59_v53, %v58_v48  ;;  %v68_v58 = vadd.f32 %v67_v54, %v66_v49  ;;  %v76_v59 = vadd.f32 %v75_v55, %v74_v50 }
  0x96   :  { %v87_v60 = vadd.f32 %v86_v51, %v52_v56  ;;  %v88_v61 = vadd.f32 %v86_v51, %v60_v57  ;;  %v89_v62 = vadd.f32 %v86_v51, %v68_v58  ;;  %v90_v63 = vadd.f32 %v86_v51, %v76_v59 }
  0x98   :  { %v91_v0 = vsub.f32 0.0, %v87_v60  ;;  %v92_v1 = vsub.f32 0.0, %v88_v61  ;;  %v93_v2 = vsub.f32 0.0, %v89_v62  ;;  %v94_v3 = vsub.f32 0.0, %v90_v63 }
  0x9a   :  { %v95_v4 = vmul.f32 1.442695, %v91_v0  ;;  %v97_v5 = vmul.f32 1.442695, %v92_v1  ;;  %v99_v6 = vmul.f32 1.442695, %v93_v2 }
  0x9b   :  { %v101_v7 = vmul.f32 1.442695, %v94_v3 }
  0x9c   :  { %153 = vpow2.f32 %v95_v4 }
  0x9d   :  { %155 = vpow2.f32 %v97_v5 }
  0x9e   :  { %157 = vpow2.f32 %v99_v6 }
  0x9f   :  { %159 = vpow2.f32 %v101_v7 }
  0xa6   :  { %v154_v8 = vpop.eup %153 }
  0xa7   :  { %v156_v9 = vpop.eup %155  ;;  %v103_v10 = vadd.f32 1.0, %v154_v8 }
  0xa8   :  { %v158_v11 = vpop.eup %157  ;;  %v104_v12 = vadd.f32 1.0, %v156_v9 }
  0xa9   :  { %v160_v13 = vpop.eup %159  ;;  %v105_v14 = vadd.f32 1.0, %v158_v11  ;;  %161 = vrcp.f32 %v103_v10 }
  0xaa   :  { %v106_v15 = vadd.f32 1.0, %v160_v13  ;;  %163 = vrcp.f32 %v104_v12 }
  0xab   :  { %165 = vrcp.f32 %v105_v14 }
  0xac   :  { %167 = vrcp.f32 %v106_v15 }
  0xb3   :  { %v162_v20 = vpop.eup %161 }
  0xb4   :  { %v164_v22 = vpop.eup %163 }
  0xb5   :  { %v166_v23 = vpop.eup %165  ;;  %v115_v24 = vcombine.low %v162_v20, %v164_v22 }
  0xb6   :  { %v168_v25 = vpop.eup %167 }
  0xb7   :  { %v116_v26 = vcombine.low %v166_v23, %v168_v25  ;;  %v123_v27 = vrot.slane %v115_v24, %v122_v21 }
  0xb9   :  { %v130_v28 = vrot.slane %v116_v26, %v122_v21 }
  0xbb   :  { %v131_v29 = vcombine.low %v123_v27, %v130_v28 }
  0xbd   :  { %v138_v30 = vrot.slane %v131_v29, %v122_v21 }
  0xbf   :  { %144 = vst.msk [vmem:[%s232_s3] sm:$0xf] %vm142_vm1, %v138_v30 }

</bundles_post_ra>
